<compile_context>
chip_gen: v7x
topology: tpu7x:2x2x1
jax: 0.10.0
libtpu: 0.0.40
codegen_flags: <defaults>
</compile_context>

<pallas_src>
import functools

import jax
import jax.numpy as jnp
import numpy as np
from jax.experimental import pallas as pl
from jax.experimental.pallas import tpu as pltpu  # noqa: F401  (TPU backend)


def _gat_layer(x, w, aux, edge_mask, *, negative_slope, apply_relu):
    """One GATConv (heads=1) on VMEM-resident values.

    aux packs [a_src; a_dst; bias] as a [3, F_out] block.
    edge_mask[i, j] is True iff there is an edge j -> i (self loops included).
    """
    a_src = aux[0:1, :]                                             # [1, F_out]
    a_dst = aux[1:2, :]                                             # [1, F_out]
    bias = aux[2:3, :]                                              # [1, F_out]

    # ---- linear projection on the MXU: h = x @ W  (GATConv lin has no bias) ----
    h = jnp.dot(x, w, preferred_element_type=jnp.float32)           # [N, F_out]

    # ---- per-node attention logits (VPU mul + lane reduce; no big transpose/MXU) ----
    e_dst = jnp.sum(h * a_dst, axis=-1, keepdims=True)              # [N, 1]
    e_src = jnp.transpose(jnp.sum(h * a_src, axis=-1, keepdims=True))  # [1, N]

    # scores[i, j] = leaky_relu(e_dst[i] + e_src[j])
    scores = e_dst + e_src                                          # [N, N]
    scores = jnp.where(scores > 0, scores, negative_slope * scores)

    # ---- masked softmax over source nodes j (per destination row i) ----
    masked = jnp.where(edge_mask, scores, jnp.float32(-1e30))       # single select
    m = jnp.max(masked, axis=-1, keepdims=True)
    p = jnp.exp(masked - m)                                         # masked entries -> exact 0
    denom = jnp.sum(p, axis=-1, keepdims=True)
    denom = jnp.maximum(denom, jnp.float32(1e-30))                  # guard (self-loops make >0)
    attn = p * pl.reciprocal(denom, approx=True)                    # EUP vrcp, ~free

    # ---- aggregation on the MXU + bias ----
    out = jnp.dot(attn, h, preferred_element_type=jnp.float32) + bias  # [N, F_out]
    if apply_relu:
        out = jnp.maximum(out, 0.0)
    return out


def _gat2_kernel(x_ref, adj_ref, w1_ref, aux1_ref, w2_ref, aux2_ref, o_ref,
                 *, negative_slope):
    edge_mask = adj_ref[...] > 0.0                                  # shared by both layers
    # conv1 -> relu (fused) -> dropout (identity: training=False) -> conv2
    h1 = _gat_layer(x_ref[...], w1_ref[...], aux1_ref[...], edge_mask,
                    negative_slope=negative_slope, apply_relu=True)
    out = _gat_layer(h1, w2_ref[...], aux2_ref[...], edge_mask,
                     negative_slope=negative_slope, apply_relu=False)
    o_ref[...] = out


def gat_forward_pallas(params, x, adj, *, negative_slope=0.2):
    """Fused 2-layer GAT forward. All operands fit in VMEM; single grid point."""
    n, f_in = x.shape
    hid = params["w1"].shape[1]
    n_cls = params["w2"].shape[1]

    # Pack per-layer attention vectors + bias into one [3, F_out] operand each
    # (fewer pallas operands -> fewer DMA descriptors; tiny concats, hoistable to init).
    aux1 = jnp.concatenate([params["a_src1"], params["a_dst1"], params["b1"]], axis=0)
    aux2 = jnp.concatenate([params["a_src2"], params["a_dst2"], params["b2"]], axis=0)

    kernel = functools.partial(_gat2_kernel, negative_slope=negative_slope)

    def full(shape):
        return pl.BlockSpec(shape, lambda: (0,) * len(shape))

    operands = (x, adj, params["w1"], aux1, params["w2"], aux2)

    # Advisory cost hint for XLA's scheduler (matmuls + softmax exp per layer).
    flops = (2 * n * f_in * hid + 2 * n * n * hid          # layer 1: x@W1, attn@h1
             + 2 * n * hid * n_cls + 2 * n * n * n_cls)    # layer 2: h1@W2, attn@h2
    bytes_accessed = 4 * (sum(int(np.prod(o.shape)) for o in operands) + n * n_cls)
    cost = pl.CostEstimate(flops=flops,
                           transcendentals=2 * n * n,       # exp in both softmaxes
                           bytes_accessed=bytes_accessed)

    return pl.pallas_call(
        kernel,
        out_shape=jax.ShapeDtypeStruct((n, n_cls), jnp.float32),
        in_specs=[full(o.shape) for o in operands],
        out_specs=full((n, n_cls)),
        cost_estimate=cost,
    )(*operands)


if __name__ == "__main__":
    N = 16            # number of graph nodes (countries)
    F_IN = 16         # GAT(num_nodes, ...) -> input feature dim (one-hot node ids)
    HID = 32          # num_channels
    NUM_CLASSES = 8   # num_classes

    key = jax.random.PRNGKey(0)
    ks = jax.random.split(key, 6)
    params = {
        "w1":     0.1 * jax.random.normal(ks[0], (F_IN, HID), jnp.float32),
        "a_src1": 0.1 * jax.random.normal(ks[1], (1, HID), jnp.float32),
        "a_dst1": 0.1 * jax.random.normal(ks[2], (1, HID), jnp.float32),
        "b1":     jnp.zeros((1, HID), jnp.float32),
        "w2":     0.1 * jax.random.normal(ks[3], (HID, NUM_CLASSES), jnp.float32),
        "a_src2": 0.1 * jax.random.normal(ks[4], (1, NUM_CLASSES), jnp.float32),
        "a_dst2": 0.1 * jax.random.normal(ks[5], (1, NUM_CLASSES), jnp.float32),
        "b2":     jnp.zeros((1, NUM_CLASSES), jnp.float32),
    }

    # node features: one-hot node-id features (dim == num_nodes), as the module implies
    x = jnp.eye(N, F_IN, dtype=jnp.float32)

    # deterministic edge list (src -> dst): directed ring + a few long-range "trade" links
    src = np.concatenate([np.arange(N), np.array([0, 3, 7, 11])])
    dst = np.concatenate([(np.arange(N) + 1) % N, np.array([8, 12, 2, 5])])
    edge_index = np.stack([src, dst])                        # [2, E]  (only used to build adj)
    edge_weight = np.ones(edge_index.shape[1], np.float32)   # accepted but unused (edge_dim=None)

    adj = np.zeros((N, N), np.float32)
    adj[dst, src] = 1.0                                      # adj[i, j]: edge j -> i
    adj[np.arange(N), np.arange(N)] = 1.0                    # add_self_loops=True
    adj = jnp.asarray(adj)

    out = jax.block_until_ready(gat_forward_pallas(params, x, adj))
    assert out.shape == (N, NUM_CLASSES)
    assert bool(jnp.all(jnp.isfinite(out)))
    print("KERNEL_OK")
</pallas_src>

<mosaic_0001>
module attributes {stable_mosaic.version = 11 : i64} {
  func.func @_gat2_kernel(%arg0: memref<16x16xf32, #tpu.memory_space<vmem>>, %arg1: memref<16x16xf32, #tpu.memory_space<vmem>>, %arg2: memref<16x32xf32, #tpu.memory_space<vmem>>, %arg3: memref<3x32xf32, #tpu.memory_space<vmem>>, %arg4: memref<32x8xf32, #tpu.memory_space<vmem>>, %arg5: memref<3x8xf32, #tpu.memory_space<vmem>>, %arg6: memref<16x8xf32, #tpu.memory_space<vmem>>) attributes {dimension_semantics = [], scalar_prefetch = 0 : i64, scratch_operands = 0 : i64, tpu.core_type = #tpu.core_type<tc>} {
    %c0 = arith.constant 0 : index
    %c0_0 = arith.constant 0 : index
    %0 = vector.load %arg1[%c0, %c0_0] : memref<16x16xf32, #tpu.memory_space<vmem>>, vector<16x16xf32>
    %cst = arith.constant 0.000000e+00 : f32
    %1 = vector.broadcast %cst : f32 to vector<16x16xf32>
    %2 = arith.cmpf ogt, %0, %1 : vector<16x16xf32>
    %c0_1 = arith.constant 0 : index
    %c0_2 = arith.constant 0 : index
    %3 = vector.load %arg0[%c0_1, %c0_2] : memref<16x16xf32, #tpu.memory_space<vmem>>, vector<16x16xf32>
    %c0_3 = arith.constant 0 : index
    %c0_4 = arith.constant 0 : index
    %4 = vector.load %arg2[%c0_3, %c0_4] : memref<16x32xf32, #tpu.memory_space<vmem>>, vector<16x32xf32>
    %c0_5 = arith.constant 0 : index
    %c0_6 = arith.constant 0 : index
    %5 = vector.load %arg3[%c0_5, %c0_6] : memref<3x32xf32, #tpu.memory_space<vmem>>, vector<3x32xf32>
    %6 = vector.extract_strided_slice %5 {offsets = [0, 0], sizes = [1, 32], strides = [1, 1]} : vector<3x32xf32> to vector<1x32xf32>
    %7 = vector.extract_strided_slice %5 {offsets = [1, 0], sizes = [1, 32], strides = [1, 1]} : vector<3x32xf32> to vector<1x32xf32>
    %8 = vector.extract_strided_slice %5 {offsets = [2, 0], sizes = [1, 32], strides = [1, 1]} : vector<3x32xf32> to vector<1x32xf32>
    %cst_7 = arith.constant dense<0.000000e+00> : vector<16x32xf32>
    %9 = tpu.matmul %3, %4, %cst_7 {dimension_numbers = #tpu.dot_dimension_numbers<[1], [0], [0], [1], [0, 0, 1, 1], [], []>} : vector<16x16xf32>, vector<16x32xf32>, vector<16x32xf32> -> vector<16x32xf32>
    %10 = vector.broadcast %7 : vector<1x32xf32> to vector<16x32xf32>
    %11 = arith.mulf %9, %10 : vector<16x32xf32>
    %cst_8 = arith.constant dense<0.000000e+00> : vector<16xf32>
    %12 = vector.multi_reduction <add>, %11, %cst_8 [1] : vector<16x32xf32> to vector<16xf32>
    %13 = vector.shape_cast %12 : vector<16xf32> to vector<16x1xf32>
    %14 = vector.broadcast %6 : vector<1x32xf32> to vector<16x32xf32>
    %15 = arith.mulf %9, %14 : vector<16x32xf32>
    %cst_9 = arith.constant dense<0.000000e+00> : vector<16xf32>
    %16 = vector.multi_reduction <add>, %15, %cst_9 [1] : vector<16x32xf32> to vector<16xf32>
    %17 = vector.shape_cast %16 : vector<16xf32> to vector<16x1xf32>
    %18 = tpu.transpose %17, [1, 0] : vector<16x1xf32> -> vector<1x16xf32>
    %19 = vector.broadcast %13 : vector<16x1xf32> to vector<16x16xf32>
    %20 = vector.broadcast %18 : vector<1x16xf32> to vector<16x16xf32>
    %21 = arith.addf %19, %20 : vector<16x16xf32>
    %cst_10 = arith.constant 0.000000e+00 : f32
    %22 = vector.broadcast %cst_10 : f32 to vector<16x16xf32>
    %23 = arith.cmpf ogt, %21, %22 : vector<16x16xf32>
    %cst_11 = arith.constant 2.000000e-01 : f32
    %24 = vector.broadcast %cst_11 : f32 to vector<16x16xf32>
    %25 = arith.mulf %24, %21 : vector<16x16xf32>
    %26 = arith.select %23, %21, %25 : vector<16x16xi1>, vector<16x16xf32>
    %cst_12 = arith.constant -1.000000e+30 : f32
    %27 = vector.broadcast %cst_12 : f32 to vector<16x16xf32>
    %28 = arith.select %2, %26, %27 : vector<16x16xi1>, vector<16x16xf32>
    %cst_13 = arith.constant dense<0xFF800000> : vector<16xf32>
    %29 = vector.multi_reduction <maximumf>, %28, %cst_13 [1] : vector<16x16xf32> to vector<16xf32>
    %30 = vector.shape_cast %29 : vector<16xf32> to vector<16x1xf32>
    %31 = vector.broadcast %30 : vector<16x1xf32> to vector<16x16xf32>
    %32 = arith.subf %28, %31 : vector<16x16xf32>
    %33 = math.exp %32 : vector<16x16xf32>
    %cst_14 = arith.constant dense<0.000000e+00> : vector<16xf32>
    %34 = vector.multi_reduction <add>, %33, %cst_14 [1] : vector<16x16xf32> to vector<16xf32>
    %35 = vector.shape_cast %34 : vector<16xf32> to vector<16x1xf32>
    %cst_15 = arith.constant 1.000000e-30 : f32
    %36 = vector.broadcast %cst_15 : f32 to vector<16x1xf32>
    %37 = arith.maximumf %35, %36 : vector<16x1xf32>
    %38 = tpu.reciprocal %37 {approx = true} : vector<16x1xf32> -> vector<16x1xf32>
    %39 = vector.broadcast %38 : vector<16x1xf32> to vector<16x16xf32>
    %40 = arith.mulf %33, %39 : vector<16x16xf32>
    %cst_16 = arith.constant dense<0.000000e+00> : vector<16x32xf32>
    %41 = tpu.matmul %40, %9, %cst_16 {dimension_numbers = #tpu.dot_dimension_numbers<[1], [0], [0], [1], [0, 0, 1, 1], [], []>} : vector<16x16xf32>, vector<16x32xf32>, vector<16x32xf32> -> vector<16x32xf32>
    %42 = vector.broadcast %8 : vector<1x32xf32> to vector<16x32xf32>
    %43 = arith.addf %41, %42 : vector<16x32xf32>
    %cst_17 = arith.constant 0.000000e+00 : f32
    %44 = vector.broadcast %cst_17 : f32 to vector<16x32xf32>
    %45 = arith.maximumf %43, %44 : vector<16x32xf32>
    %c0_18 = arith.constant 0 : index
    %c0_19 = arith.constant 0 : index
    %46 = vector.load %arg4[%c0_18, %c0_19] : memref<32x8xf32, #tpu.memory_space<vmem>>, vector<32x8xf32>
    %c0_20 = arith.constant 0 : index
    %c0_21 = arith.constant 0 : index
    %47 = vector.load %arg5[%c0_20, %c0_21] : memref<3x8xf32, #tpu.memory_space<vmem>>, vector<3x8xf32>
    %48 = vector.extract_strided_slice %47 {offsets = [0, 0], sizes = [1, 8], strides = [1, 1]} : vector<3x8xf32> to vector<1x8xf32>
    %49 = vector.extract_strided_slice %47 {offsets = [1, 0], sizes = [1, 8], strides = [1, 1]} : vector<3x8xf32> to vector<1x8xf32>
    %50 = vector.extract_strided_slice %47 {offsets = [2, 0], sizes = [1, 8], strides = [1, 1]} : vector<3x8xf32> to vector<1x8xf32>
    %cst_22 = arith.constant dense<0.000000e+00> : vector<16x8xf32>
    %51 = tpu.matmul %45, %46, %cst_22 {dimension_numbers = #tpu.dot_dimension_numbers<[1], [0], [0], [1], [0, 0, 1, 1], [], []>} : vector<16x32xf32>, vector<32x8xf32>, vector<16x8xf32> -> vector<16x8xf32>
    %52 = vector.broadcast %49 : vector<1x8xf32> to vector<16x8xf32>
    %53 = arith.mulf %51, %52 : vector<16x8xf32>
    %cst_23 = arith.constant dense<0.000000e+00> : vector<16xf32>
    %54 = vector.multi_reduction <add>, %53, %cst_23 [1] : vector<16x8xf32> to vector<16xf32>
    %55 = vector.shape_cast %54 : vector<16xf32> to vector<16x1xf32>
    %56 = vector.broadcast %48 : vector<1x8xf32> to vector<16x8xf32>
    %57 = arith.mulf %51, %56 : vector<16x8xf32>
    %cst_24 = arith.constant dense<0.000000e+00> : vector<16xf32>
    %58 = vector.multi_reduction <add>, %57, %cst_24 [1] : vector<16x8xf32> to vector<16xf32>
    %59 = vector.shape_cast %58 : vector<16xf32> to vector<16x1xf32>
    %60 = tpu.transpose %59, [1, 0] : vector<16x1xf32> -> vector<1x16xf32>
    %61 = vector.broadcast %55 : vector<16x1xf32> to vector<16x16xf32>
    %62 = vector.broadcast %60 : vector<1x16xf32> to vector<16x16xf32>
    %63 = arith.addf %61, %62 : vector<16x16xf32>
    %cst_25 = arith.constant 0.000000e+00 : f32
    %64 = vector.broadcast %cst_25 : f32 to vector<16x16xf32>
    %65 = arith.cmpf ogt, %63, %64 : vector<16x16xf32>
    %cst_26 = arith.constant 2.000000e-01 : f32
    %66 = vector.broadcast %cst_26 : f32 to vector<16x16xf32>
    %67 = arith.mulf %66, %63 : vector<16x16xf32>
    %68 = arith.select %65, %63, %67 : vector<16x16xi1>, vector<16x16xf32>
    %cst_27 = arith.constant -1.000000e+30 : f32
    %69 = vector.broadcast %cst_27 : f32 to vector<16x16xf32>
    %70 = arith.select %2, %68, %69 : vector<16x16xi1>, vector<16x16xf32>
    %cst_28 = arith.constant dense<0xFF800000> : vector<16xf32>
    %71 = vector.multi_reduction <maximumf>, %70, %cst_28 [1] : vector<16x16xf32> to vector<16xf32>
    %72 = vector.shape_cast %71 : vector<16xf32> to vector<16x1xf32>
    %73 = vector.broadcast %72 : vector<16x1xf32> to vector<16x16xf32>
    %74 = arith.subf %70, %73 : vector<16x16xf32>
    %75 = math.exp %74 : vector<16x16xf32>
    %cst_29 = arith.constant dense<0.000000e+00> : vector<16xf32>
    %76 = vector.multi_reduction <add>, %75, %cst_29 [1] : vector<16x16xf32> to vector<16xf32>
    %77 = vector.shape_cast %76 : vector<16xf32> to vector<16x1xf32>
    %cst_30 = arith.constant 1.000000e-30 : f32
    %78 = vector.broadcast %cst_30 : f32 to vector<16x1xf32>
    %79 = arith.maximumf %77, %78 : vector<16x1xf32>
    %80 = tpu.reciprocal %79 {approx = true} : vector<16x1xf32> -> vector<16x1xf32>
    %81 = vector.broadcast %80 : vector<16x1xf32> to vector<16x16xf32>
    %82 = arith.mulf %75, %81 : vector<16x16xf32>
    %cst_31 = arith.constant dense<0.000000e+00> : vector<16x8xf32>
    %83 = tpu.matmul %82, %51, %cst_31 {dimension_numbers = #tpu.dot_dimension_numbers<[1], [0], [0], [1], [0, 0, 1, 1], [], []>} : vector<16x16xf32>, vector<16x8xf32>, vector<16x8xf32> -> vector<16x8xf32>
    %84 = vector.broadcast %50 : vector<1x8xf32> to vector<16x8xf32>
    %85 = arith.addf %83, %84 : vector<16x8xf32>
    %c0_32 = arith.constant 0 : index
    %c0_33 = arith.constant 0 : index
    %86 = vector.load %arg6[%c0_32, %c0_33] : memref<16x8xf32, #tpu.memory_space<vmem>>, vector<16x8xf32>
    tpu.vector_store %arg6[%c0_32, %c0_33], %85 {strides = array<i32>} : memref<16x8xf32, #tpu.memory_space<vmem>>, vector<16x8xf32>,
    return
  }
}

</mosaic_0001>

<bundles_post_ra>
// kernel: tpu_custom_call.1
= control target key start
LH: loop header
LB: loop body
LE: loop exit
PB: predicated region body
PF: predicated region fallthrough
CT: control target
= control target key end

     0   :  { %11 = vsyncpa [#allocation3], 0  ;;  %s705_s21 = smov [#allocation2]   ;;  %s860_s0 = inlined_call_operand.vmem [shape: f32[16,16], index: 0, kind: input, shape index: {}]   ;;  %s861_s1 = inlined_call_operand.vmem [shape: f32[16,16], index: 1, kind: input, shape index: {}]   ;;  %s862_s2 = inlined_call_operand.hbm [shape: f32[16,32], index: 2, kind: input, shape index: {}]   ;;  %s863_s3 = inlined_call_operand.vmem [shape: f32[3,32], index: 3, kind: input, shape index: {}]   ;;  %s864_s4 = inlined_call_operand.vmem [shape: f32[32,8], index: 4, kind: input, shape index: {}]   ;;  %s865_s5 = inlined_call_operand.vmem [shape: f32[3,8], index: 5, kind: input, shape index: {}]   ;;  %s866_s6 = inlined_call_operand.vmem [shape: f32[16,8], index: 6, kind: output, shape index: {}]  }
   0x1   :  { %s21_s22 = sshll.u32 %s705_s21, 4  ;;  %s681_s25 = scalar_lea.hbm %s862_s2, 256  ;;  %s22_s22 = int_to_ptr.vmem [resolvable:$true] %s21_s22 }
   0x2   :  { %p682_p0 = scmp.ne.s32.totalorder %s862_s2, %s681_s25  ;;  %p685_p1 = scmp.lt.u32.totalorder %s681_s25, %s862_s2 }
   0x4   :  { %p687_p2 = pnand %p685_p1, %p682_p0 }
   0x6   :  { %690 = shalt.err (!%p687_p2)
}
   0x7   :  { %s691_s30 = scalar_lea.vmem %s22_s22, 256  ;;  %p696_p4 = scmp.lt.s32.totalorder %s22_s22, %s22_s22 }
   0x8   :  { %p692_p3 = scmp.ne.s32.totalorder %s22_s22, %s691_s30  ;;  %p697_p5 = scmp.lt.s32.totalorder %s691_s30, %s691_s30 }
   0xa   :  { %p698_p6 = por %p697_p5, %p696_p4 }
   0xc   :  { %p699_p7 = pnand %p698_p6, %p692_p3 }
   0xe   :  { %702 = shalt.err (!%p699_p7)
}
   0xf   :  { %s706_s7 = smov 128   ;;  %s707_s8 = smov 8  }
  0x10   :  { %27 = dma.hbm_to_vmem [thread:$0]  %s862_s2, 256, %s22_s22, [#allocation3], %s706_s7, %s706_s7, %s707_s8  }
  0x11   :  { %703 = dma.done.wait [#allocation3], 256  }
  0x12   :  { %704 = vsyncadd [#allocation3], 4294967040  ;;  %vm46_vm0 = vcmask 130048   ;;  %v43_v0 = vld [vmem:[#allocation2] sm:$0xff]  ;;  %v44_v1 = vld [vmem:[#allocation2 + $0x8] sm:$0xff]  ;;  %v128_v5 = vlaneseq  ;;  %vm134_vm1 = vcmask 261120  }
  0x13   :  { %v41_v2 = vld [vmem:[%s860_s0] sm:$0xff]  ;;  %v641_v3 = vpack.c.bf16 %v44_v1, %v43_v0  ;;  %v42_v4 = vld [vmem:[%s860_s0 + $0x8] sm:$0xff]  ;;  %v312_v62 = vld [vmem:[%s864_s4 + $0x10] sm:$0xff]  ;;  %vm402_vm6 = vcmask 64512  }
  0x14   :  { %613 = vmatprep.mubr.msk.f32.mxu0 %vm46_vm0, %v41_v2  ;;  %v763_v6 = vshrl.u32 %v128_v5, 7  ;;  %v772_v9 = vld [vmem:[%s863_s3] sm:$0x7]  ;;  %v793_v32 = vld [vmem:[%s861_s1 + $0x8] sm:$0xff]  ;;  %v313_v63 = vld [vmem:[%s864_s4 + $0x18] sm:$0xff] }
  0x15   :  { %642 = vmatprep.subr.bf16.mxu0 %v641_v3  ;;  %v787_v28 = vld [vmem:[%s861_s1] sm:$0xff]  ;;  %vm40_vm5 = vcmp.gt.f32.partialorder %v793_v32, 0.0  ;;  %v311_v52 = vld [vmem:[%s864_s4 + $0x8] sm:$0xff]  ;;  %v653_v0 = vpack.c.bf16 %v313_v63, %v312_v62 }
  0x16   :  { %644 = vmatpush3.bf16.msra.mxu0 %v641_v3  ;;  %v766_v7 = vsub.s32 0, %v763_v6  ;;  %v130_v8 = vsub.s32 1, %v763_v6  ;;  %vm39_vm2 = vcmp.gt.f32.partialorder %v787_v28, 0.0  ;;  %v310_v51 = vld [vmem:[%s864_s4] sm:$0xff]  ;;  %v225_v1 = vsub.s32 2, %v763_v6 }
  0x17   :  { %v649_v53 = vpack.c.bf16 %v311_v52, %v310_v51 }
  0x18   :  { %v144_v10 = vrot.slane %v772_v9, %v766_v7  ;;  %v131_v11 = vrot.slane %v772_v9, %v130_v8  ;;  %v226_v2 = vrot.slane %v772_v9, %v225_v1 }
  0x19   :  { %614 = vmatmul.mubr.msk.f32.vlgmr.msra.gmra.mrb[0].mxu0 %vm46_vm0, %v42_v4  ;;  %650 = vmatprep.subr.bf16.mxu0 %v649_v53 }
  0x1a   :  { %652 = vmatpush3.bf16.msra.mxu0 %v649_v53 }
  0x1b   :  { %654 = vmatprep.subr.bf16.mxu0 %v653_v0 }
  0x1e   :  { %656 = vmatpush3.bf16.msra.mxu0 %v653_v0 }
  0xec   :  { %v615_v12 = vpop.f32.mrb[0].mxu0 }
  0xed   :  { %v119_v13 = vpop.f32.mrb[1].mxu0  ;;  %v146_v19 = vmul.f32 %v615_v12, %v144_v10  ;;  %v133_v20 = vmul.f32 %v615_v12, %v131_v11 }
  0xee   :  { %v645_v14 = vpack.c.bf16 %v615_v12, %v119_v13  ;;  %v145_v15 = vmul.f32 %v144_v10, %v119_v13  ;;  %v132_v16 = vmul.f32 %v131_v11, %v119_v13  ;;  %v827_v13 = vld [vmem:[%s865_s5] sm:$0x7] }
  0xef   :  { %v150_v21 = vsel %vm134_vm1, %v146_v19, 0.0  ;;  %v138_v22 = vsel %vm134_vm1, %v133_v20, 0.0 }
  0xf0   :  { %646 = vmatprep.subr.bf16.mxu1 %v645_v14  ;;  %v147_v17 = vsel %vm134_vm1, %v145_v15, 0.0  ;;  %v135_v18 = vsel %vm134_vm1, %v132_v16, 0.0 }
  0xf1   :  { %648 = vmatpush3.bf16.msra.mxu1 %v645_v14  ;;  %148 = vadd.xlane.f32.xlu0 %v147_v17  ;;  %v412_v14 = vrot.slane %v827_v13, %v766_v7 }
  0xf2   :  { %136 = vadd.xlane.f32.xlu1 %v135_v18  ;;  %v399_v18 = vrot.slane %v827_v13, %v130_v8 }
  0xf5   :  { %151 = vadd.xlane.f32.xlu0 %v150_v21 }
  0xf6   :  { %139 = vadd.xlane.f32.xlu1 %v138_v22 }
 0x17e   :  { %v149_v23 = vpop.xlane.xlu0 %148 }
 0x17f   :  { %153 = vxpose.xlu0.b32.start [1/2] (short) (narrow) %v149_v23, 8  ;;  %v137_v25 = vpop.xlane.xlu1 %136 }
 0x182   :  { %v152_v24 = vpop.xlane.xlu0 %151 }
 0x183   :  { %154 = vxpose.xlu0.b32.end [2/2] (short) (narrow) %v152_v24, 8  ;;  %v140_v29 = vpop.xlane.xlu1 %139 }
 0x1ff   :  { %v169_v26 = vpop.trf.xlu0 }
 0x200   :  { %v188_v27 = vrot.slane %v169_v26, %v766_v7 }
 0x202   :  { %v189_v30 = vadd.f32 %v188_v27, %v137_v25  ;;  %v190_v31 = vadd.f32 %v188_v27, %v140_v29 }
 0x204   :  { %vm191_vm3 = vcmp.gt.f32.partialorder %v189_v30, 0.0  ;;  %v193_v33 = vmul.f32 0.2, %v189_v30  ;;  %vm192_vm4 = vcmp.gt.f32.partialorder %v190_v31, 0.0  ;;  %v194_v34 = vmul.f32 0.2, %v190_v31 }
 0x206   :  { %v195_v35 = vsel %vm191_vm3, %v189_v30, %v193_v33  ;;  %v196_v36 = vsel %vm192_vm4, %v190_v31, %v194_v34 }
 0x207   :  { %v197_v37 = vsel %vm39_vm2, %v195_v35, -1e+30  ;;  %v198_v39 = vsel %vm40_vm5, %v196_v36, -1e+30 }
 0x208   :  { %v199_v38 = vsel %vm46_vm0, %v197_v37, -inf  ;;  %v202_v40 = vsel %vm46_vm0, %v198_v39, -inf }
 0x209   :  { %200 = vmax.xlane.f32.xlu1 %v199_v38 }
 0x20d   :  { %203 = vmax.xlane.f32.xlu1 %v202_v40 }
 0x296   :  { %v201_v41 = vpop.xlane.xlu1 %200 }
 0x297   :  { %v205_v42 = vsub.f32 %v197_v37, %v201_v41 }
 0x299   :  { %v207_v43 = vmul.f32 1.442695, %v205_v42 }
 0x29a   :  { %v204_v44 = vpop.xlane.xlu1 %203 }
 0x29b   :  { %665 = vpow2.f32 %v207_v43  ;;  %v206_v45 = vsub.f32 %v198_v39, %v204_v44 }
 0x29d   :  { %v209_v46 = vmul.f32 1.442695, %v206_v45 }
 0x29f   :  { %667 = vpow2.f32 %v209_v46 }
 0x2a5   :  { %v666_v47 = vpop.eup %665 }
 0x2a6   :  { %v211_v48 = vsel %vm46_vm0, %v666_v47, 0.0 }
 0x2a7   :  { %212 = vadd.xlane.f32.xlu1 %v211_v48 }
 0x2a9   :  { %v668_v49 = vpop.eup %667 }
 0x2aa   :  { %v214_v50 = vsel %vm46_vm0, %v668_v49, 0.0 }
 0x2ab   :  { %215 = vadd.xlane.f32.xlu1 %v214_v50 }
 0x334   :  { %v213_v54 = vpop.xlane.xlu1 %212 }
 0x335   :  { %v217_v55 = vmax.f32 %v213_v54, 1e-30 }
 0x337   :  { %669 = vrcp.f32 %v217_v55 }
 0x338   :  { %v216_v56 = vpop.xlane.xlu1 %215 }
 0x339   :  { %v218_v57 = vmax.f32 %v216_v56, 1e-30 }
 0x33b   :  { %671 = vrcp.f32 %v218_v57 }
 0x341   :  { %v670_v58 = vpop.eup %669 }
 0x342   :  { %v221_v59 = vmul.f32 %v670_v58, %v666_v47  ;;  %v494_v58 = vrot.slane %v827_v13, %v225_v1 }
 0x344   :  { %620 = vmatprep.mubr.msk.f32.mxu1 %vm46_vm0, %v221_v59 }
 0x345   :  { %v672_v60 = vpop.eup %671 }
 0x346   :  { %v222_v61 = vmul.f32 %v672_v60, %v668_v49 }
 0x348   :  { %621 = vmatmul.mubr.msk.f32.vlgmr.msra.gmra.mrb[0].mxu1 %vm46_vm0, %v222_v61 }
 0x41b   :  { %v622_v3 = vpop.f32.mrb[0].mxu1 }
 0x41c   :  { %v305_v4 = vadd.f32 %v622_v3, %v226_v2  ;;  %v299_v5 = vpop.f32.mrb[1].mxu1 }
 0x41d   :  { %v300_v10 = vadd.f32 %v299_v5, %v226_v2 }
 0x41e   :  { %v309_v12 = vmax.f32 %v305_v4, 0.0 }
 0x41f   :  { %v308_v11 = vmax.f32 %v300_v10, 0.0 }
 0x421   :  { %631 = vmatprep.mubr.msk.f32.mxu0 %vm134_vm1, %v308_v11 }
 0x422   :  { %632 = vmatmul.mubr.msk.f32.vlgmr.msra.gmra.mrb[2].mxu0 %vm134_vm1, %v309_v12 }
 0x4f5   :  { %v633_v15 = vpop.f32.mrb[2].mxu0 }
 0x4f6   :  { %v387_v9 = vpop.f32.mrb[3].mxu0  ;;  %v414_v20 = vmul.f32 %v633_v15, %v412_v14  ;;  %v401_v22 = vmul.f32 %v633_v15, %v399_v18 }
 0x4f7   :  { %v413_v16 = vmul.f32 %v412_v14, %v387_v9  ;;  %v657_v17 = vpack.c.bf16 %v633_v15, %v387_v9  ;;  %v400_v23 = vmul.f32 %v399_v18, %v387_v9 }
 0x4f8   :  { %v418_v21 = vsel %vm402_vm6, %v414_v20, 0.0  ;;  %v406_v24 = vsel %vm402_vm6, %v401_v22, 0.0 }
 0x4f9   :  { %658 = vmatprep.subr.bf16.mxu1 %v657_v17  ;;  %v415_v19 = vsel %vm402_vm6, %v413_v16, 0.0  ;;  %v403_v25 = vsel %vm402_vm6, %v400_v23, 0.0 }
 0x4fa   :  { %660 = vmatpush3.bf16.msra.mxu1 %v657_v17  ;;  %416 = vadd.xlane.f32.xlu1 %v415_v19 }
 0x4fe   :  { %419 = vadd.xlane.f32.xlu1 %v418_v21 }
 0x502   :  { %407 = vadd.xlane.f32.xlu1 %v406_v24 }
 0x506   :  { %404 = vadd.xlane.f32.xlu1 %v403_v25 }
 0x587   :  { %v417_v26 = vpop.xlane.xlu1 %416 }
 0x588   :  { %421 = vxpose.xlu1.b32.start [1/2] (short) (narrow) %v417_v26, 8 }
 0x58b   :  { %v420_v8 = vpop.xlane.xlu1 %419 }
 0x58c   :  { %422 = vxpose.xlu1.b32.end [2/2] (short) (narrow) %v420_v8, 8 }
 0x58f   :  { %v408_v27 = vpop.xlane.xlu1 %407 }
 0x593   :  { %v405_v29 = vpop.xlane.xlu1 %404 }
 0x608   :  { %v437_v30 = vpop.trf.xlu1 }
 0x609   :  { %v456_v31 = vrot.slane %v437_v30, %v766_v7 }
 0x60b   :  { %v457_v33 = vadd.f32 %v456_v31, %v405_v29  ;;  %v458_v34 = vadd.f32 %v456_v31, %v408_v27 }
 0x60d   :  { %vm460_vm7 = vcmp.gt.f32.partialorder %v458_v34, 0.0  ;;  %v462_v35 = vmul.f32 0.2, %v458_v34  ;;  %vm459_vm8 = vcmp.gt.f32.partialorder %v457_v33, 0.0  ;;  %v461_v36 = vmul.f32 0.2, %v457_v33 }
 0x60f   :  { %v464_v37 = vsel %vm460_vm7, %v458_v34, %v462_v35  ;;  %v463_v38 = vsel %vm459_vm8, %v457_v33, %v461_v36 }
 0x610   :  { %v466_v39 = vsel %vm40_vm5, %v464_v37, -1e+30  ;;  %v465_v40 = vsel %vm39_vm2, %v463_v38, -1e+30 }
 0x611   :  { %v470_v41 = vsel %vm46_vm0, %v466_v39, -inf  ;;  %v467_v42 = vsel %vm46_vm0, %v465_v40, -inf }
 0x612   :  { %471 = vmax.xlane.f32.xlu1 %v470_v41  ;;  %468 = vmax.xlane.f32.xlu0 %v467_v42 }
 0x69f   :  { %v472_v7 = vpop.xlane.xlu1 %471  ;;  %v469_v43 = vpop.xlane.xlu0 %468 }
 0x6a0   :  { %v474_v44 = vsub.f32 %v466_v39, %v472_v7  ;;  %v473_v45 = vsub.f32 %v465_v40, %v469_v43 }
 0x6a2   :  { %v475_v46 = vmul.f32 1.442695, %v473_v45  ;;  %v477_v47 = vmul.f32 1.442695, %v474_v44 }
 0x6a4   :  { %673 = vpow2.f32 %v475_v46 }
 0x6a5   :  { %675 = vpow2.f32 %v477_v47 }
 0x6ae   :  { %v674_v48 = vpop.eup %673 }
 0x6af   :  { %v479_v32 = vsel %vm46_vm0, %v674_v48, 0.0  ;;  %v676_v49 = vpop.eup %675 }
 0x6b0   :  { %480 = vadd.xlane.f32.xlu0 %v479_v32  ;;  %v482_v28 = vsel %vm46_vm0, %v676_v49, 0.0 }
 0x6b4   :  { %483 = vadd.xlane.f32.xlu0 %v482_v28 }
 0x73d   :  { %v481_v50 = vpop.xlane.xlu0 %480 }
 0x73e   :  { %v485_v51 = vmax.f32 %v481_v50, 1e-30 }
 0x740   :  { %677 = vrcp.f32 %v485_v51 }
 0x741   :  { %v484_v52 = vpop.xlane.xlu0 %483 }
 0x742   :  { %v486_v53 = vmax.f32 %v484_v52, 1e-30 }
 0x744   :  { %679 = vrcp.f32 %v486_v53 }
 0x74a   :  { %v678_v54 = vpop.eup %677 }
 0x74b   :  { %v489_v55 = vmul.f32 %v678_v54, %v674_v48 }
 0x74d   :  { %638 = vmatprep.mubr.msk.f32.mxu1 %vm46_vm0, %v489_v55 }
 0x74e   :  { %v680_v56 = vpop.eup %679 }
 0x74f   :  { %v490_v57 = vmul.f32 %v680_v56, %v676_v49 }
 0x751   :  { %639 = vmatmul.mubr.msk.f32.vlgmr.msra.gmra.mrb[2].mxu1 %vm46_vm0, %v490_v57 }
 0x824   :  { %v640_v59 = vpop.f32.mrb[2].mxu1 }
 0x825   :  { %v573_v60 = vadd.f32 %v640_v59, %v494_v58  ;;  %v567_v61 = vpop.f32.mrb[3].mxu1 }
 0x826   :  { %v568_v62 = vadd.f32 %v567_v61, %v494_v58 }
 0x827   :  { %577 = vst.msk [vmem:[%s866_s6 + $0x8] sm:$0xff] %vm402_vm6, %v573_v60 }
 0x828   :  { %576 = vst.msk [vmem:[%s866_s6] sm:$0xff] %vm402_vm6, %v568_v62 }
 0x829   :  { %582 = vsyncpa [#allocation3], 1 }

</bundles_post_ra>
